<compile_context>
chip_gen: v5e
topology: v5e:2x2
jax: 0.10.0
libtpu: 0.0.40
codegen_flags: <defaults>
</compile_context>

<pallas_src>
import jax
import jax.numpy as jnp
from jax.experimental import pallas as pl
from jax.experimental.pallas import tpu as pltpu

LANE = 128          # lane width: every feature dim is padded to this
_BN_EPS = 1e-5
_N_PARAM_ROWS = 8 + 5 * LANE   # 648 rows, multiple of 8 (sublane aligned)


def _dyna_mlp_kernel(act_ref, p_ref, out_ref):
    """act_ref: [B, 2*LANE]  lanes 0..127 = padded MLP input x,
                             lanes 128..255 = padded last-observation residual.
       p_ref:   [648, LANE]  packed parameter slab (see module docstring).
       out_ref: [B, LANE]    padded output (real data in lanes 0..state_dim-1).
    """
    x = act_ref[:, 0:LANE]                 # [B, 128] f32
    resid = act_ref[:, LANE:2 * LANE]      # [B, 128] f32

    bn_g = p_ref[0:1, :]
    bn_b = p_ref[1:2, :]
    b1 = p_ref[2:3, :]
    b2 = p_ref[3:4, :]
    b3 = p_ref[4:5, :]
    b4 = p_ref[5:6, :]
    b5 = p_ref[6:7, :]

    # ---- BatchNorm1d (training mode), fused single-pass statistics ----
    inv_b = 1.0 / x.shape[0]
    mean = jnp.sum(x, axis=0, keepdims=True) * inv_b           # [1, 128]
    mean_sq = jnp.sum(x * x, axis=0, keepdims=True) * inv_b    # [1, 128]
    var = jnp.maximum(mean_sq - mean * mean, 0.0)              # biased variance
    xh = (x - mean) * jax.lax.rsqrt(var + _BN_EPS)
    xh = xh * bn_g + bn_b

    # ---- MLP: Linear -> ReLU (x4) -> Linear; all 128-wide MXU tiles ----
    h = jnp.dot(xh, p_ref[8:136, :], preferred_element_type=jnp.float32) + b1
    h = jnp.maximum(h, 0.0)
    h = jnp.dot(h, p_ref[136:264, :], preferred_element_type=jnp.float32) + b2
    h = jnp.maximum(h, 0.0)
    h = jnp.dot(h, p_ref[264:392, :], preferred_element_type=jnp.float32) + b3
    h = jnp.maximum(h, 0.0)
    h = jnp.dot(h, p_ref[392:520, :], preferred_element_type=jnp.float32) + b4
    h = jnp.maximum(h, 0.0)
    out = jnp.dot(h, p_ref[520:648, :], preferred_element_type=jnp.float32) + b5

    # ---- residual: output + observation[:, -1] (zero in padded lanes) ----
    out_ref[...] = out + resid


def _layer_dims(input_dim, nf, state_dim):
    return [(input_dim, nf), (nf, 2 * nf), (2 * nf, 2 * nf), (2 * nf, nf),
            (nf, state_dim)]


def pack_params(params, input_dim, nf, state_dim):
    """Pack bn_g/bn_b/w1..w5/b1..b5 into one lane-dense [648, 128] f32 slab."""
    assert input_dim <= LANE and 2 * nf <= LANE and state_dim <= LANE
    slab = jnp.zeros((_N_PARAM_ROWS, LANE), jnp.float32)
    slab = slab.at[0, :input_dim].set(params["bn_g"].reshape(-1).astype(jnp.float32))
    slab = slab.at[1, :input_dim].set(params["bn_b"].reshape(-1).astype(jnp.float32))
    for i, (fin, fout) in enumerate(_layer_dims(input_dim, nf, state_dim)):
        slab = slab.at[2 + i, :fout].set(
            params[f"b{i + 1}"].reshape(-1).astype(jnp.float32))
        r0 = 8 + i * LANE
        slab = slab.at[r0:r0 + fin, :fout].set(
            params[f"w{i + 1}"].astype(jnp.float32))
    return slab


def dyna_net_mlp_forward(observation, action, param_slab):
    """observation: [B, n_his, state_dim], action: [B, n_his, action_dim],
       param_slab: [648, 128] from pack_params. Returns [B, state_dim]."""
    B, n_his, state_dim = observation.shape
    action_dim = action.shape[-1]
    input_dim = (state_dim + action_dim) * n_his

    # Lane-dense activation slab: [ x (padded to 128) | last_obs (padded) ].
    x = jnp.concatenate(
        [observation.reshape(B, -1), action.reshape(B, -1)], axis=1)
    act = jnp.zeros((B, 2 * LANE), jnp.float32)
    act = act.at[:, :input_dim].set(x.astype(jnp.float32))
    act = act.at[:, LANE:LANE + state_dim].set(
        observation[:, -1, :].astype(jnp.float32))

    vmem = pl.BlockSpec(memory_space=pltpu.MemorySpace.VMEM)
    cost = pl.CostEstimate(
        flops=2 * B * 5 * LANE * LANE,
        transcendentals=0,
        bytes_accessed=int(param_slab.size * 4 + act.size * 4 + B * LANE * 4),
    )
    out_padded = pl.pallas_call(
        _dyna_mlp_kernel,
        out_shape=jax.ShapeDtypeStruct((B, LANE), jnp.float32),
        in_specs=[vmem, vmem],
        out_specs=vmem,
        cost_estimate=cost,
    )(act, param_slab)
    return out_padded[:, :state_dim]


def init_params(key, input_dim, nf, state_dim):
    """PyTorch-style U(-1/sqrt(fan_in), +1/sqrt(fan_in)) init; weights [in, out]."""
    params = {
        "bn_g": jnp.ones((1, input_dim), jnp.float32),
        "bn_b": jnp.zeros((1, input_dim), jnp.float32),
    }
    for i, (fin, fout) in enumerate(_layer_dims(input_dim, nf, state_dim), start=1):
        key, kw, kb = jax.random.split(key, 3)
        bound = 1.0 / (fin ** 0.5)
        params[f"w{i}"] = jax.random.uniform(kw, (fin, fout), jnp.float32, -bound, bound)
        params[f"b{i}"] = jax.random.uniform(kb, (1, fout), jnp.float32, -bound, bound)
    return params


def _reference_forward(observation, action, params):
    """Pure-JAX reference matching the PyTorch module (train-mode BN)."""
    B = observation.shape[0]
    x = jnp.concatenate(
        [observation.reshape(B, -1), action.reshape(B, -1)], axis=1
    ).astype(jnp.float32)
    mean = jnp.mean(x, axis=0, keepdims=True)
    var = jnp.mean((x - mean) ** 2, axis=0, keepdims=True)
    h = (x - mean) / jnp.sqrt(var + _BN_EPS) * params["bn_g"] + params["bn_b"]
    for i in range(1, 5):
        h = jnp.maximum(h @ params[f"w{i}"] + params[f"b{i}"], 0.0)
    out = h @ params["w5"] + params["b5"]
    return out + observation[:, -1, :]


if __name__ == "__main__":
    # config-implied small shapes
    B = 2
    n_his = 2
    state_dim = 16      # e.g. object_state_shape=[3,4] (12) + robot state 4
    action_dim = 4
    nf = 32             # nf_hidden
    input_dim = (state_dim + action_dim) * n_his   # 40

    key = jax.random.PRNGKey(0)
    k_obs, k_act, k_par = jax.random.split(key, 3)
    observation = jax.random.normal(k_obs, (B, n_his, state_dim), jnp.float32)
    action = jax.random.normal(k_act, (B, n_his, action_dim), jnp.float32)
    params = init_params(k_par, input_dim, nf, state_dim)
    param_slab = pack_params(params, input_dim, nf, state_dim)

    out = dyna_net_mlp_forward(observation, action, param_slab)
    jax.block_until_ready(out)
    assert out.shape == (B, state_dim), out.shape

    ref = _reference_forward(observation, action, params)
    assert jnp.allclose(out, ref, atol=2e-3, rtol=2e-3), (
        float(jnp.max(jnp.abs(out - ref))))
    print("KERNEL_OK")
</pallas_src>

<mosaic_0001>
module attributes {stable_mosaic.version = 11 : i64} {
  func.func @_dyna_mlp_kernel(%arg0: memref<2x256xf32, #tpu.memory_space<vmem>>, %arg1: memref<648x128xf32, #tpu.memory_space<vmem>>, %arg2: memref<2x128xf32, #tpu.memory_space<vmem>>) attributes {dimension_semantics = [], scalar_prefetch = 0 : i64, scratch_operands = 0 : i64, tpu.core_type = #tpu.core_type<tc>} {
    %c0 = arith.constant 0 : index
    %c0_0 = arith.constant 0 : index
    %0 = vector.load %arg0[%c0, %c0_0] : memref<2x256xf32, #tpu.memory_space<vmem>>, vector<2x128xf32>
    %c0_1 = arith.constant 0 : index
    %c128 = arith.constant 128 : index
    %1 = vector.load %arg0[%c0_1, %c128] : memref<2x256xf32, #tpu.memory_space<vmem>>, vector<2x128xf32>
    %c0_2 = arith.constant 0 : index
    %c0_3 = arith.constant 0 : index
    %2 = vector.load %arg1[%c0_2, %c0_3] : memref<648x128xf32, #tpu.memory_space<vmem>>, vector<1x128xf32>
    %c1 = arith.constant 1 : index
    %c0_4 = arith.constant 0 : index
    %3 = vector.load %arg1[%c1, %c0_4] : memref<648x128xf32, #tpu.memory_space<vmem>>, vector<1x128xf32>
    %c2 = arith.constant 2 : index
    %c0_5 = arith.constant 0 : index
    %4 = vector.load %arg1[%c2, %c0_5] : memref<648x128xf32, #tpu.memory_space<vmem>>, vector<1x128xf32>
    %c3 = arith.constant 3 : index
    %c0_6 = arith.constant 0 : index
    %5 = vector.load %arg1[%c3, %c0_6] : memref<648x128xf32, #tpu.memory_space<vmem>>, vector<1x128xf32>
    %c4 = arith.constant 4 : index
    %c0_7 = arith.constant 0 : index
    %6 = vector.load %arg1[%c4, %c0_7] : memref<648x128xf32, #tpu.memory_space<vmem>>, vector<1x128xf32>
    %c5 = arith.constant 5 : index
    %c0_8 = arith.constant 0 : index
    %7 = vector.load %arg1[%c5, %c0_8] : memref<648x128xf32, #tpu.memory_space<vmem>>, vector<1x128xf32>
    %c6 = arith.constant 6 : index
    %c0_9 = arith.constant 0 : index
    %8 = vector.load %arg1[%c6, %c0_9] : memref<648x128xf32, #tpu.memory_space<vmem>>, vector<1x128xf32>
    %cst = arith.constant dense<0.000000e+00> : vector<128xf32>
    %9 = vector.multi_reduction <add>, %0, %cst [0] : vector<2x128xf32> to vector<128xf32>
    %10 = vector.shape_cast %9 : vector<128xf32> to vector<1x128xf32>
    %cst_10 = arith.constant 5.000000e-01 : f32
    %11 = vector.broadcast %cst_10 : f32 to vector<1x128xf32>
    %12 = arith.mulf %10, %11 : vector<1x128xf32>
    %13 = arith.mulf %0, %0 : vector<2x128xf32>
    %cst_11 = arith.constant dense<0.000000e+00> : vector<128xf32>
    %14 = vector.multi_reduction <add>, %13, %cst_11 [0] : vector<2x128xf32> to vector<128xf32>
    %15 = vector.shape_cast %14 : vector<128xf32> to vector<1x128xf32>
    %cst_12 = arith.constant 5.000000e-01 : f32
    %16 = vector.broadcast %cst_12 : f32 to vector<1x128xf32>
    %17 = arith.mulf %15, %16 : vector<1x128xf32>
    %18 = arith.mulf %12, %12 : vector<1x128xf32>
    %19 = arith.subf %17, %18 : vector<1x128xf32>
    %cst_13 = arith.constant 0.000000e+00 : f32
    %20 = vector.broadcast %cst_13 : f32 to vector<1x128xf32>
    %21 = arith.maximumf %19, %20 : vector<1x128xf32>
    %22 = vector.broadcast %12 : vector<1x128xf32> to vector<2x128xf32>
    %23 = arith.subf %0, %22 : vector<2x128xf32>
    %cst_14 = arith.constant 9.99999974E-6 : f32
    %24 = vector.broadcast %cst_14 : f32 to vector<1x128xf32>
    %25 = arith.addf %21, %24 : vector<1x128xf32>
    %26 = math.rsqrt %25 : vector<1x128xf32>
    %27 = vector.broadcast %26 : vector<1x128xf32> to vector<2x128xf32>
    %28 = arith.mulf %23, %27 : vector<2x128xf32>
    %29 = vector.broadcast %2 : vector<1x128xf32> to vector<2x128xf32>
    %30 = arith.mulf %28, %29 : vector<2x128xf32>
    %31 = vector.broadcast %3 : vector<1x128xf32> to vector<2x128xf32>
    %32 = arith.addf %30, %31 : vector<2x128xf32>
    %c8 = arith.constant 8 : index
    %c0_15 = arith.constant 0 : index
    %33 = vector.load %arg1[%c8, %c0_15] : memref<648x128xf32, #tpu.memory_space<vmem>>, vector<128x128xf32>
    %cst_16 = arith.constant dense<0.000000e+00> : vector<2x128xf32>
    %34 = tpu.matmul %32, %33, %cst_16 {dimension_numbers = #tpu.dot_dimension_numbers<[1], [0], [0], [1], [0, 0, 1, 1], [], []>} : vector<2x128xf32>, vector<128x128xf32>, vector<2x128xf32> -> vector<2x128xf32>
    %35 = vector.broadcast %4 : vector<1x128xf32> to vector<2x128xf32>
    %36 = arith.addf %34, %35 : vector<2x128xf32>
    %cst_17 = arith.constant 0.000000e+00 : f32
    %37 = vector.broadcast %cst_17 : f32 to vector<2x128xf32>
    %38 = arith.maximumf %36, %37 : vector<2x128xf32>
    %c136 = arith.constant 136 : index
    %c0_18 = arith.constant 0 : index
    %39 = vector.load %arg1[%c136, %c0_18] : memref<648x128xf32, #tpu.memory_space<vmem>>, vector<128x128xf32>
    %cst_19 = arith.constant dense<0.000000e+00> : vector<2x128xf32>
    %40 = tpu.matmul %38, %39, %cst_19 {dimension_numbers = #tpu.dot_dimension_numbers<[1], [0], [0], [1], [0, 0, 1, 1], [], []>} : vector<2x128xf32>, vector<128x128xf32>, vector<2x128xf32> -> vector<2x128xf32>
    %41 = vector.broadcast %5 : vector<1x128xf32> to vector<2x128xf32>
    %42 = arith.addf %40, %41 : vector<2x128xf32>
    %cst_20 = arith.constant 0.000000e+00 : f32
    %43 = vector.broadcast %cst_20 : f32 to vector<2x128xf32>
    %44 = arith.maximumf %42, %43 : vector<2x128xf32>
    %c264 = arith.constant 264 : index
    %c0_21 = arith.constant 0 : index
    %45 = vector.load %arg1[%c264, %c0_21] : memref<648x128xf32, #tpu.memory_space<vmem>>, vector<128x128xf32>
    %cst_22 = arith.constant dense<0.000000e+00> : vector<2x128xf32>
    %46 = tpu.matmul %44, %45, %cst_22 {dimension_numbers = #tpu.dot_dimension_numbers<[1], [0], [0], [1], [0, 0, 1, 1], [], []>} : vector<2x128xf32>, vector<128x128xf32>, vector<2x128xf32> -> vector<2x128xf32>
    %47 = vector.broadcast %6 : vector<1x128xf32> to vector<2x128xf32>
    %48 = arith.addf %46, %47 : vector<2x128xf32>
    %cst_23 = arith.constant 0.000000e+00 : f32
    %49 = vector.broadcast %cst_23 : f32 to vector<2x128xf32>
    %50 = arith.maximumf %48, %49 : vector<2x128xf32>
    %c392 = arith.constant 392 : index
    %c0_24 = arith.constant 0 : index
    %51 = vector.load %arg1[%c392, %c0_24] : memref<648x128xf32, #tpu.memory_space<vmem>>, vector<128x128xf32>
    %cst_25 = arith.constant dense<0.000000e+00> : vector<2x128xf32>
    %52 = tpu.matmul %50, %51, %cst_25 {dimension_numbers = #tpu.dot_dimension_numbers<[1], [0], [0], [1], [0, 0, 1, 1], [], []>} : vector<2x128xf32>, vector<128x128xf32>, vector<2x128xf32> -> vector<2x128xf32>
    %53 = vector.broadcast %7 : vector<1x128xf32> to vector<2x128xf32>
    %54 = arith.addf %52, %53 : vector<2x128xf32>
    %cst_26 = arith.constant 0.000000e+00 : f32
    %55 = vector.broadcast %cst_26 : f32 to vector<2x128xf32>
    %56 = arith.maximumf %54, %55 : vector<2x128xf32>
    %c520 = arith.constant 520 : index
    %c0_27 = arith.constant 0 : index
    %57 = vector.load %arg1[%c520, %c0_27] : memref<648x128xf32, #tpu.memory_space<vmem>>, vector<128x128xf32>
    %cst_28 = arith.constant dense<0.000000e+00> : vector<2x128xf32>
    %58 = tpu.matmul %56, %57, %cst_28 {dimension_numbers = #tpu.dot_dimension_numbers<[1], [0], [0], [1], [0, 0, 1, 1], [], []>} : vector<2x128xf32>, vector<128x128xf32>, vector<2x128xf32> -> vector<2x128xf32>
    %59 = vector.broadcast %8 : vector<1x128xf32> to vector<2x128xf32>
    %60 = arith.addf %58, %59 : vector<2x128xf32>
    %61 = arith.addf %60, %1 : vector<2x128xf32>
    %c0_29 = arith.constant 0 : index
    %c0_30 = arith.constant 0 : index
    %62 = vector.load %arg2[%c0_29, %c0_30] : memref<2x128xf32, #tpu.memory_space<vmem>>, vector<2x128xf32>
    tpu.vector_store %arg2[%c0_29, %c0_30], %61 {strides = array<i32>} : memref<2x128xf32, #tpu.memory_space<vmem>>, vector<2x128xf32>,
    return
  }
}

</mosaic_0001>

<bundles_post_ra>
// kernel: tpu_custom_call.1
= control target key start
LH: loop header
LB: loop body
LE: loop exit
PB: predicated region body
PF: predicated region fallthrough
CT: control target
= control target key end

     0   :  { %7 = vsyncpa [#allocation3], 0  ;;  %s425_s0 = inlined_call_operand.hbm [shape: f32[2,256], index: 0, kind: input, shape index: {}]   ;;  %s426_s1 = inlined_call_operand.hbm [shape: f32[648,128], index: 1, kind: input, shape index: {}]   ;;  %s427_s2 = inlined_call_operand.hbm [shape: f32[2,128], index: 2, kind: output, shape index: {}]  }
   0x1   :  { %8 = vsyncpa [#allocation6], 0 }
   0x2   :  { %9 = vsyncpa [#allocation4], 0  ;;  %s15_s11 = sshll.u32 %s425_s0, 4  ;;  %s390_s12 = smov [#allocation2]   ;;  %s16_s11 = int_to_ptr.hbm [resolvable:$true] %s15_s11 }
   0x3   :  { %s17_s13 = sshll.u32 %s390_s12, 4  ;;  %s25_s16 = sshll.u32 %s426_s1, 4  ;;  %s18_s13 = int_to_ptr.vmem [resolvable:$true] %s17_s13  ;;  %s26_s16 = int_to_ptr.hbm [resolvable:$true] %s25_s16 }
   0x4   :  { %20 = dma.hbm_to_vmem [thread:$0]  %s16_s11, 64, %s18_s13, [#allocation3]  }
   0x5   :  { %s391_s17 = smov [#allocation5]   ;;  %s392_s19 = smov 128  }
   0x6   :  { %s27_s18 = sshll.u32 %s391_s17, 4  ;;  %s393_s20 = smov 8   ;;  %s28_s18 = int_to_ptr.vmem [resolvable:$true] %s27_s18 }
   0x7   :  { %33 = dma.hbm_to_vmem [thread:$0]  %s26_s16, 10368, %s28_s18, [#allocation6], %s392_s19, %s392_s19, %s393_s20  }
   0x8   :  { %384 = dma.done.wait [#allocation3], 64  }
   0x9   :  { %385 = vsyncadd [#allocation3], 4294967232 }
   0xa   :  { %386 = dma.done.wait [#allocation6], 10368  }
   0xb   :  { %387 = vsyncadd [#allocation6], 4294956928  ;;  %v104_v0 = vld [vmem:[#allocation5 + $0x80] sm:$0xff]  ;;  %v103_v1 = vld [vmem:[#allocation5 + $0x78] sm:$0xff]  ;;  %vm51_vm0 = vcmask 1041408   ;;  %s394_s0 = smov [#allocation7]  }
   0xc   :  { %106 = vmatpush.msra.mxu0 %v104_v0  ;;  %v102_v2 = vld [vmem:[#allocation5 + $0x70] sm:$0xff]  ;;  %v101_v3 = vld [vmem:[#allocation5 + $0x68] sm:$0xff]  ;;  %v416_v4 = vld [vmem:[#allocation2] sm:$0x3]  ;;  %s285_s1 = sshll.u32 %s394_s0, 4  ;;  %s287_s23 = sshll.u32 %s427_s2, 4  ;;  %s286_s1 = int_to_ptr.vmem [resolvable:$true] %s285_s1  ;;  %s288_s23 = int_to_ptr.hbm [resolvable:$true] %s287_s23 }
   0xd   :  { %v100_v5 = vld [vmem:[#allocation5 + $0x60] sm:$0xff]  ;;  %v52_v6 = vsel %vm51_vm0, %v416_v4, 0.0  ;;  %v60_v7 = vmul.f32 %v416_v4, %v416_v4  ;;  %v99_v9 = vld [vmem:[#allocation5 + $0x58] sm:$0xff]  ;;  %v98_v13 = vld [vmem:[#allocation5 + $0x50] sm:$0xff] }
   0xe   :  { %107 = vmatpush.msra.mxu0 %v103_v1  ;;  %v53_v8 = vrot.slane %v52_v6, 4  ;;  %v97_v16 = vld [vmem:[#allocation5 + $0x48] sm:$0xff]  ;;  %v96_v19 = vld [vmem:[#allocation5 + $0x40] sm:$0xff]  ;;  %v95_v22 = vld [vmem:[#allocation5 + $0x38] sm:$0xff] }
   0xf   :  { %v61_v10 = vsel %vm51_vm0, %v60_v7, 0.0  ;;  %v94_v25 = vld [vmem:[#allocation5 + $0x30] sm:$0xff]  ;;  %v93_v28 = vld [vmem:[#allocation5 + $0x28] sm:$0xff]  ;;  %v142_v31 = vld [vmem:[#allocation5 + $0x100] sm:$0xff] }
  0x10   :  { %108 = vmatpush.msra.mxu0 %v102_v2  ;;  %v54_v11 = vadd.f32 %v53_v8, %v52_v6  ;;  %v62_v12 = vrot.slane %v61_v10, 4  ;;  %v141_v32 = vld [vmem:[#allocation5 + $0xf8] sm:$0xff]  ;;  %v92_v33 = vld [vmem:[#allocation5 + $0x20] sm:$0xff]  ;;  %144 = vmatpush.msra.mxu1 %v142_v31  ;;  %v140_v35 = vld [vmem:[#allocation5 + $0xf0] sm:$0xff] }
  0x11   :  { %v91_v36 = vld [vmem:[#allocation5 + $0x18] sm:$0xff]  ;;  %v139_v38 = vld [vmem:[#allocation5 + $0xe8] sm:$0xff]  ;;  %v90_v39 = vld [vmem:[#allocation5 + $0x10] sm:$0xff] }
  0x12   :  { %109 = vmatpush.msra.mxu0 %v101_v3  ;;  %v55_v14 = vrot.slane %v54_v11, 2  ;;  %v63_v15 = vadd.f32 %v62_v12, %v61_v10  ;;  %145 = vmatpush.msra.mxu1 %v141_v32  ;;  %v138_v41 = vld [vmem:[#allocation5 + $0xe0] sm:$0xff]  ;;  %v89_v42 = vld [vmem:[#allocation5 + $0x8] sm:$0xff]  ;;  %v137_v43 = vld [vmem:[#allocation5 + $0xd8] sm:$0xff] }
  0x13   :  { %v136_v44 = vld [vmem:[#allocation5 + $0xd0] sm:$0xff]  ;;  %v135_v45 = vld [vmem:[#allocation5 + $0xc8] sm:$0xff]  ;;  %v134_v47 = vld [vmem:[#allocation5 + $0xc0] sm:$0xff] }
  0x14   :  { %110 = vmatpush.msra.mxu0 %v100_v5  ;;  %v56_v17 = vadd.f32 %v55_v14, %v54_v11  ;;  %v64_v18 = vrot.slane %v63_v15, 2  ;;  %146 = vmatpush.msra.mxu1 %v140_v35  ;;  %v133_v49 = vld [vmem:[#allocation5 + $0xb8] sm:$0xff]  ;;  %v132_v51 = vld [vmem:[#allocation5 + $0xb0] sm:$0xff]  ;;  %v131_v53 = vld [vmem:[#allocation5 + $0xa8] sm:$0xff] }
  0x15   :  { %v130_v56 = vld [vmem:[#allocation5 + $0xa0] sm:$0xff]  ;;  %v129_v0 = vld [vmem:[#allocation5 + $0x98] sm:$0xff]  ;;  %v128_v1 = vld [vmem:[#allocation5 + $0x90] sm:$0xff] }
  0x16   :  { %111 = vmatpush.msra.mxu0 %v99_v9  ;;  %v57_v20 = vrot.slane %v56_v17, 1  ;;  %v65_v21 = vadd.f32 %v64_v18, %v63_v15  ;;  %147 = vmatpush.msra.mxu1 %v139_v38  ;;  %v303_v58 = vld [vmem:[#allocation5] ss:$0 sm:$0xff]  ;;  %v304_v61 = vld [vmem:[#allocation5 + $0x1] ss:$0 sm:$0xff]  ;;  %v127_v2 = vld [vmem:[#allocation5 + $0x88] sm:$0xff] }
  0x17   :  { %v180_v3 = vld [vmem:[#allocation5 + $0x180] sm:$0xff]  ;;  %v178_v5 = vld [vmem:[#allocation5 + $0x170] sm:$0xff]  ;;  %v177_v6 = vld [vmem:[#allocation5 + $0x168] sm:$0xff] }
  0x18   :  { %112 = vmatpush.msra.mxu0 %v98_v13  ;;  %v58_v23 = vadd.f32 %v57_v20, %v56_v17  ;;  %v66_v24 = vrot.slane %v65_v21, 1  ;;  %148 = vmatpush.msra.mxu1 %v138_v41  ;;  %v176_v7 = vld [vmem:[#allocation5 + $0x160] sm:$0xff]  ;;  %v175_v8 = vld [vmem:[#allocation5 + $0x158] sm:$0xff]  ;;  %v174_v9 = vld [vmem:[#allocation5 + $0x150] sm:$0xff] }
  0x19   :  { %182 = vmatpush.msra.mxu2 %v180_v3  ;;  %v173_v10 = vld [vmem:[#allocation5 + $0x148] sm:$0xff]  ;;  %v172_v11 = vld [vmem:[#allocation5 + $0x140] sm:$0xff]  ;;  %v171_v12 = vld [vmem:[#allocation5 + $0x138] sm:$0xff] }
  0x1a   :  { %113 = vmatpush.msra.mxu0 %v97_v16  ;;  %v59_v26 = vmul.f32 0.5, %v58_v23  ;;  %v67_v27 = vadd.f32 %v66_v24, %v65_v21  ;;  %149 = vmatpush.msra.mxu1 %v137_v43  ;;  %v170_v13 = vld [vmem:[#allocation5 + $0x130] sm:$0xff]  ;;  %v169_v14 = vld [vmem:[#allocation5 + $0x128] sm:$0xff]  ;;  %v168_v15 = vld [vmem:[#allocation5 + $0x120] sm:$0xff] }
  0x1b   :  { %v305_v16 = vld [vmem:[#allocation5 + $0x2] ss:$0 sm:$0xff]  ;;  %v167_v20 = vld [vmem:[#allocation5 + $0x118] sm:$0xff]  ;;  %v166_v21 = vld [vmem:[#allocation5 + $0x110] sm:$0xff] }
  0x1c   :  { %114 = vmatpush.msra.mxu0 %v96_v19  ;;  %v68_v29 = vmul.f32 0.5, %v67_v27  ;;  %v69_v30 = vmul.f32 %v59_v26, %v59_v26  ;;  %150 = vmatpush.msra.mxu1 %v136_v44  ;;  %v72_v55 = vsub.f32 %v416_v4, %v59_v26  ;;  %v179_v4 = vld [vmem:[#allocation5 + $0x178] sm:$0xff]  ;;  %v218_v23 = vld [vmem:[#allocation5 + $0x200] sm:$0xff]  ;;  %v215_v26 = vld [vmem:[#allocation5 + $0x1e8] sm:$0xff] }
  0x1d   :  { %183 = vmatpush.msra.mxu2 %v179_v4  ;;  %v217_v24 = vld [vmem:[#allocation5 + $0x1f8] sm:$0xff]  ;;  %220 = vmatpush.msra.mxu3 %v218_v23  ;;  %v214_v27 = vld [vmem:[#allocation5 + $0x1e0] sm:$0xff]  ;;  %v204_v41 = vld [vmem:[#allocation5 + $0x190] sm:$0xff] }
  0x1e   :  { %115 = vmatpush.msra.mxu0 %v95_v22  ;;  %v70_v34 = vsub.f32 %v68_v29, %v69_v30  ;;  %151 = vmatpush.msra.mxu1 %v135_v45  ;;  %v165_v22 = vld [vmem:[#allocation5 + $0x108] sm:$0xff]  ;;  %v212_v29 = vld [vmem:[#allocation5 + $0x1d0] sm:$0xff]  ;;  %v210_v31 = vld [vmem:[#allocation5 + $0x1c0] sm:$0xff] }
  0x1f   :  { %184 = vmatpush.msra.mxu2 %v178_v5  ;;  %221 = vmatpush.msra.mxu3 %v217_v24  ;;  %v211_v30 = vld [vmem:[#allocation5 + $0x1c8] sm:$0xff]  ;;  %v209_v32 = vld [vmem:[#allocation5 + $0x1b8] sm:$0xff]  ;;  %v206_v35 = vld [vmem:[#allocation5 + $0x1a0] sm:$0xff] }
  0x20   :  { %116 = vmatpush.msra.mxu0 %v94_v25  ;;  %v71_v37 = vmax.f32 %v70_v34, 0.0  ;;  %152 = vmatpush.msra.mxu1 %v134_v47  ;;  %v216_v25 = vld [vmem:[#allocation5 + $0x1f0] sm:$0xff]  ;;  %v207_v34 = vld [vmem:[#allocation5 + $0x1a8] sm:$0xff]  ;;  %v256_v43 = vld [vmem:[#allocation5 + $0x280] sm:$0xff] }
  0x21   :  { %185 = vmatpush.msra.mxu2 %v177_v6  ;;  %222 = vmatpush.msra.mxu3 %v216_v25  ;;  %v255_v44 = vld [vmem:[#allocation5 + $0x278] sm:$0xff]  ;;  %v254_v45 = vld [vmem:[#allocation5 + $0x270] sm:$0xff]  ;;  %v252_v47 = vld [vmem:[#allocation5 + $0x260] sm:$0xff] }
  0x22   :  { %117 = vmatpush.msra.mxu0 %v93_v28  ;;  %v73_v40 = vadd.f32 1e-05, %v71_v37  ;;  %153 = vmatpush.msra.mxu1 %v133_v49  ;;  %v213_v28 = vld [vmem:[#allocation5 + $0x1d8] sm:$0xff]  ;;  %v250_v49 = vld [vmem:[#allocation5 + $0x250] sm:$0xff]  ;;  %v309_v3 = vld [vmem:[#allocation5 + $0x6] ss:$0 sm:$0xff] }
  0x23   :  { %186 = vmatpush.msra.mxu2 %v176_v7  ;;  %223 = vmatpush.msra.mxu3 %v215_v26  ;;  %v43_v4 = vld [vmem:[#allocation2 + $0x2] sm:$0x3] }
  0x24   :  { %118 = vmatpush.msra.mxu0 %v92_v33  ;;  %310 = vrsqrt.f32 %v73_v40  ;;  %vm80_vm1 = vweird.f32 %v73_v40  ;;  %154 = vmatpush.msra.mxu1 %v132_v51  ;;  %v208_v33 = vld [vmem:[#allocation5 + $0x1b0] sm:$0xff]  ;;  %v248_v51 = vld [vmem:[#allocation5 + $0x240] sm:$0xff] }
  0x25   :  { %187 = vmatpush.msra.mxu2 %v175_v8  ;;  %224 = vmatpush.msra.mxu3 %v214_v27 }
  0x26   :  { %119 = vmatpush.msra.mxu0 %v91_v36  ;;  %155 = vmatpush.msra.mxu1 %v131_v53  ;;  %v306_v36 = vld [vmem:[#allocation5 + $0x3] ss:$0 sm:$0xff]  ;;  %v246_v53 = vld [vmem:[#allocation5 + $0x230] sm:$0xff] }
  0x27   :  { %188 = vmatpush.msra.mxu2 %v174_v9  ;;  %225 = vmatpush.msra.mxu3 %v213_v28 }
  0x28   :  { %120 = vmatpush.msra.mxu0 %v90_v39  ;;  %156 = vmatpush.msra.mxu1 %v130_v56  ;;  %v307_v56 = vld [vmem:[#allocation5 + $0x4] ss:$0 sm:$0xff] }
  0x29   :  { %189 = vmatpush.msra.mxu2 %v173_v10  ;;  %226 = vmatpush.msra.mxu3 %v212_v29 }
  0x2a   :  { %121 = vmatpush.msra.mxu0 %v89_v42  ;;  %v311_v46 = vpop.eup %310  ;;  %157 = vmatpush.msra.mxu1 %v129_v0  ;;  %v203_v42 = vld [vmem:[#allocation5 + $0x188] sm:$0xff] }
  0x2b   :  { %v75_v48 = vmul.f32 %v311_v46, %v73_v40  ;;  %vm81_vm2 = vweird.f32 %v311_v46  ;;  %190 = vmatpush.msra.mxu2 %v172_v11  ;;  %227 = vmatpush.msra.mxu3 %v211_v30  ;;  %v205_v40 = vld [vmem:[#allocation5 + $0x198] sm:$0xff] }
  0x2c   :  { %vm82_vm3 = vmor %vm80_vm1, %vm81_vm2  ;;  %158 = vmatpush.msra.mxu1 %v128_v1  ;;  %258 = vmatpush.msrb.mxu0 %v256_v43 }
  0x2d   :  { %v76_v50 = vmul.f32 %v311_v46, %v75_v48  ;;  %191 = vmatpush.msra.mxu2 %v171_v12  ;;  %228 = vmatpush.msra.mxu3 %v210_v31  ;;  %v251_v48 = vld [vmem:[#allocation5 + $0x258] sm:$0xff] }
  0x2e   :  { %159 = vmatpush.msra.mxu1 %v127_v2  ;;  %259 = vmatpush.msrb.mxu0 %v255_v44 }
  0x2f   :  { %v77_v52 = vmul.f32 0.5, %v76_v50  ;;  %192 = vmatpush.msra.mxu2 %v170_v13  ;;  %229 = vmatpush.msra.mxu3 %v209_v32  ;;  %v249_v50 = vld [vmem:[#allocation5 + $0x248] sm:$0xff] }
  0x30   :  { %260 = vmatpush.msrb.mxu0 %v254_v45 }
  0x31   :  { %v78_v54 = vsub.f32 1.5, %v77_v52  ;;  %193 = vmatpush.msra.mxu2 %v169_v14  ;;  %230 = vmatpush.msra.mxu3 %v208_v33  ;;  %v247_v52 = vld [vmem:[#allocation5 + $0x238] sm:$0xff] }
  0x33   :  { %v79_v57 = vmul.f32 %v311_v46, %v78_v54  ;;  %194 = vmatpush.msra.mxu2 %v168_v15  ;;  %231 = vmatpush.msra.mxu3 %v207_v34  ;;  %v245_v54 = vld [vmem:[#allocation5 + $0x228] sm:$0xff] }
  0x35   :  { %v83_v59 = vsel %vm82_vm3, %v311_v46, %v79_v57  ;;  %195 = vmatpush.msra.mxu2 %v167_v20  ;;  %232 = vmatpush.msra.mxu3 %v206_v35  ;;  %v253_v46 = vld [vmem:[#allocation5 + $0x268] sm:$0xff] }
  0x36   :  { %v84_v60 = vmul.f32 %v83_v59, %v72_v55  ;;  %261 = vmatpush.msrb.mxu0 %v253_v46  ;;  %v244_v55 = vld [vmem:[#allocation5 + $0x220] sm:$0xff] }
  0x37   :  { %196 = vmatpush.msra.mxu2 %v166_v21  ;;  %233 = vmatpush.msra.mxu3 %v205_v40 }
  0x38   :  { %v86_v62 = vmul.f32 %v303_v58, %v84_v60  ;;  %262 = vmatpush.msrb.mxu0 %v252_v47  ;;  %v243_v60 = vld [vmem:[#allocation5 + $0x218] sm:$0xff] }
  0x39   :  { %197 = vmatpush.msra.mxu2 %v165_v22  ;;  %234 = vmatpush.msra.mxu3 %v204_v41 }
  0x3a   :  { %v88_v63 = vadd.f32 %v304_v61, %v86_v62  ;;  %263 = vmatpush.msrb.mxu0 %v251_v48  ;;  %v242_v61 = vld [vmem:[#allocation5 + $0x210] sm:$0xff]  ;;  %v241_v62 = vld [vmem:[#allocation5 + $0x208] sm:$0xff] }
  0x3b   :  { %235 = vmatpush.msra.mxu3 %v203_v42 }
  0x3c   :  { %122 = vmatmul.f32.vlgmr.msra.gmra.mxu0 %v88_v63  ;;  %v308_v63 = vld [vmem:[#allocation5 + $0x5] ss:$0 sm:$0xff] }
  0x3d   :  { %264 = vmatpush.msrb.mxu0 %v250_v49 }
  0x3f   :  { %265 = vmatpush.msrb.mxu0 %v249_v50 }
  0x41   :  { %266 = vmatpush.msrb.mxu0 %v248_v51 }
  0x43   :  { %267 = vmatpush.msrb.mxu0 %v247_v52 }
  0x45   :  { %268 = vmatpush.msrb.mxu0 %v246_v53 }
  0x47   :  { %269 = vmatpush.msrb.mxu0 %v245_v54 }
  0x49   :  { %270 = vmatpush.msrb.mxu0 %v244_v55 }
  0x4b   :  { %271 = vmatpush.msrb.mxu0 %v243_v60 }
  0x4d   :  { %272 = vmatpush.msrb.mxu0 %v242_v61 }
  0x4f   :  { %273 = vmatpush.msrb.mxu0 %v241_v62 }
  0xb9   :  { %v123_v17 = vpop.f32.mrf.mxu0 }
  0xba   :  { %v124_v18 = vadd.f32 %v305_v16, %v123_v17 }
  0xbc   :  { %v126_v19 = vmax.f32 %v124_v18, 0.0 }
  0xbe   :  { %160 = vmatmul.f32.vlgmr.msra.gmra.mxu1 %v126_v19 }
 0x13b   :  { %v161_v37 = vpop.f32.mrf.mxu1 }
 0x13c   :  { %v162_v38 = vadd.f32 %v306_v36, %v161_v37 }
 0x13e   :  { %v164_v39 = vmax.f32 %v162_v38, 0.0 }
 0x140   :  { %198 = vmatmul.f32.vlgmr.msra.gmra.mxu2 %v164_v39 }
 0x1c3   :  { %v199_v57 = vpop.f32.mrf.mxu2 }
 0x1c4   :  { %v200_v58 = vadd.f32 %v307_v56, %v199_v57 }
 0x1c6   :  { %v202_v59 = vmax.f32 %v200_v58, 0.0 }
 0x1c8   :  { %236 = vmatmul.f32.vlgmr.msra.gmra.mxu3 %v202_v59 }
 0x24b   :  { %v237_v0 = vpop.f32.mrf.mxu3 }
 0x24c   :  { %v238_v1 = vadd.f32 %v308_v63, %v237_v0 }
 0x24e   :  { %v240_v2 = vmax.f32 %v238_v1, 0.0 }
 0x250   :  { %274 = vmatmul.f32.vlgmr.msrb.gmra.mxu0 %v240_v2 }
 0x2cd   :  { %v275_v5 = vpop.f32.mrf.mxu0 }
 0x2ce   :  { %v276_v6 = vadd.f32 %v309_v3, %v275_v5 }
 0x2d0   :  { %v278_v7 = vadd.f32 %v276_v6, %v43_v4 }
 0x2d2   :  { %279 = vst [vmem:[#allocation7] sm:$0x3] %v278_v7 }
 0x2d3   :  { %290 = dma.vmem_to_hbm [thread:$0]  %s286_s1, 32, %s288_s23, [#allocation4]  }
 0x2d4   :  { %388 = dma.done.wait [#allocation4], 32  }
 0x2d5   :  { %389 = vsyncadd [#allocation4], 4294967264 }
 0x2d6   :  { %295 = vsyncpa [#allocation3], 1 }
 0x2d7   :  { %296 = vsyncpa [#allocation6], 1 }
 0x2d8   :  { %297 = vsyncpa [#allocation4], 1 }

</bundles_post_ra>
